<compile_context>
chip_gen: v6e
topology: v6e:2x2x1
jax: 0.10.0
libtpu: 0.0.40
codegen_flags: <defaults>
</compile_context>

<pallas_src>
import functools

import jax
import jax.numpy as jnp
from jax import lax
from jax.experimental import pallas as pl
from jax.experimental.pallas import tpu as pltpu

_LANE = 128


@functools.lru_cache(maxsize=None)
def _approx_recip_supported():
    """One-time probe: does this build lower pl.reciprocal(approx=True)?"""
    def _k(x_ref, o_ref):
        o_ref[...] = pl.reciprocal(x_ref[...], approx=True)
    try:
        x = jnp.full((8, _LANE), 2.0, jnp.float32)
        jax.block_until_ready(
            pl.pallas_call(
                _k, out_shape=jax.ShapeDtypeStruct((8, _LANE), jnp.float32))(x))
        return True
    except Exception:  # probe only; the real kernel is never re-traced
        return False


def _projector_kernel(H, W, with_mask, use_approx_recip,
                      params_ref, bounds_ref,          # SMEM scalar prefetch
                      depth_ref, img_ref,              # VMEM inputs
                      warped_ref, *rest):              # outputs + scratch
    if with_mask:
        mask_ref, acc00_ref, acc10_ref = rest
    else:
        mask_ref = None
        acc00_ref, acc10_ref = rest

    b = pl.program_id(0)
    p = pl.program_id(1)
    num_pt = pl.num_programs(1)
    TP = depth_ref.shape[2]
    C = img_ref.shape[1]

    # ---- pixel coordinates generated in-kernel (no pix-grid HBM traffic) ----
    lane = lax.broadcasted_iota(jnp.int32, (1, TP), 1).astype(jnp.float32)
    idxf = (p * TP).astype(jnp.float32) + lane
    py = jnp.floor((idxf + 0.5) * (1.0 / float(W)))     # exact for HW < 2**24
    px = idxf - py * float(W)

    d = depth_ref[0]                                    # (1, TP)

    # ---- host-folded camera: R = (K@T)[:3,:3] @ inv_K[:3,:3], t = (K@T)[:3,3]
    pb = b * 12
    r00 = params_ref[pb + 0]; r01 = params_ref[pb + 1]; r02 = params_ref[pb + 2]
    r10 = params_ref[pb + 3]; r11 = params_ref[pb + 4]; r12 = params_ref[pb + 5]
    r20 = params_ref[pb + 6]; r21 = params_ref[pb + 7]; r22 = params_ref[pb + 8]
    t0 = params_ref[pb + 9]; t1 = params_ref[pb + 10]; t2 = params_ref[pb + 11]

    qx = (r00 * px + r01 * py + r02) * d + t0
    qy = (r10 * px + r11 * py + r12) * d + t1
    qz = (r20 * px + r21 * py + r22) * d + t2

    den = qz + 1e-8                 # same epsilon semantics as the PyTorch ref
    if use_approx_recip:
        inv0 = pl.reciprocal(den, approx=True)          # EUP slot
        inv_den = inv0 * (2.0 - den * inv0)             # 1 Newton step ~f32 exact
    else:
        inv_den = 1.0 / den
    u = qx * inv_den
    v = qy * inv_den

    if with_mask:
        # (u/(W-1) - .5)*2 in [-1,1]  <=>  u in [0, W-1]  (no normalisation ops)
        inb = (u >= 0.0) & (u <= float(W - 1)) & (v >= 0.0) & (v <= float(H - 1))
        mask_ref[0] = inb.astype(jnp.float32)

    # ---- grid_sample: bilinear, padding_mode='border', align_corners=True ---
    ix = jnp.clip(u, 0.0, float(W - 1))
    iy = jnp.clip(v, 0.0, float(H - 1))
    x0f = jnp.floor(ix)
    y0f = jnp.floor(iy)
    wx = ix - x0f                                        # (1, TP)
    wy = iy - y0f
    x0 = x0f.astype(jnp.int32)
    y0 = y0f.astype(jnp.int32)
    y1 = jnp.minimum(y0 + 1, H - 1)
    # Only two distinct index vectors: the x+1 corners come packed with them.
    idx00 = jnp.broadcast_to(y0 * W + x0, (C, TP))
    idx10 = jnp.broadcast_to(y1 * W + x0, (C, TP))

    # ---- bounded chunked gather over the packed image ------------------------
    bb = (b * num_pt + p) * 2
    lo_c = bounds_ref[bb + 0]
    hi_c = bounds_ref[bb + 1]

    acc00_ref[...] = jnp.zeros_like(acc00_ref)
    acc10_ref[...] = jnp.zeros_like(acc10_ref)

    @pl.loop(0, hi_c - lo_c + 1)
    def _(step):
        base = pl.multiple_of((lo_c + step) * _LANE, _LANE)
        src = img_ref[0, :, pl.ds(base, _LANE)]          # (C, 128) u32 chunk
        loc00 = idx00 - base
        loc10 = idx10 - base
        g00 = jnp.take_along_axis(src, jnp.clip(loc00, 0, _LANE - 1), axis=1)
        g10 = jnp.take_along_axis(src, jnp.clip(loc10, 0, _LANE - 1), axis=1)
        acc00_ref[...] = jnp.where((loc00 >= 0) & (loc00 < _LANE),
                                   g00, acc00_ref[...])
        acc10_ref[...] = jnp.where((loc10 >= 0) & (loc10 < _LANE),
                                   g10, acc10_ref[...])

    def unpack(packed):                                  # bf16 pair -> two f32
        v_at = pltpu.bitcast(packed << 16, jnp.float32)               # img[i]
        v_nx = pltpu.bitcast(packed & jnp.uint32(0xFFFF0000), jnp.float32)  # img[i+1]
        return v_at, v_nx

    v00, v01 = unpack(acc00_ref[...])
    v10, v11 = unpack(acc10_ref[...])

    top = v00 + (v01 - v00) * wx
    bot = v10 + (v11 - v10) * wx
    warped_ref[0] = (top + (bot - top) * wy).astype(warped_ref.dtype)


def _pick_tile(HW_pad):
    for cand in (512, 256, 128):
        if HW_pad % cand == 0:
            return cand
    return _LANE


def _fold_camera(inv_K, T, K):
    B = K.shape[0]
    KT = jnp.matmul(K.astype(jnp.float32), T.astype(jnp.float32))[:, :3, :]
    R = jnp.matmul(KT[:, :, :3], inv_K[:, :3, :3].astype(jnp.float32))
    t = KT[:, :, 3]
    return jnp.concatenate([R.reshape(B, 9), t], axis=1)        # (B, 12) f32


def _pack_pixel_pairs(img_flat):
    """(B,C,HWp) f32 -> u32: low 16 bits = bf16(img[i]), high = bf16(img[i+1])."""
    bf = img_flat.astype(jnp.bfloat16)
    nxt = jnp.concatenate([bf[..., 1:], bf[..., -1:]], axis=-1)
    lo = lax.bitcast_convert_type(bf, jnp.uint16).astype(jnp.uint32)
    hi = lax.bitcast_convert_type(nxt, jnp.uint16).astype(jnp.uint32)
    return lo | (hi << 16)


def _tile_bounds(params, depth_bhw, H, W, HW_pad, TP):
    """Per (batch, tile) inclusive [lo, hi] 128-lane chunk span the kernel sweeps."""
    B = depth_bhw.shape[0]
    num_pt = HW_pad // TP
    idx = jnp.arange(HW_pad, dtype=jnp.float32)
    py = jnp.floor((idx + 0.5) / W)
    px = idx - py * W
    R = params[:, :9].reshape(B, 3, 3)
    t = params[:, 9:]
    r = lambda i, j: R[:, i, j][:, None]
    tt = lambda i: t[:, i][:, None]
    d = depth_bhw
    qx = (r(0, 0) * px + r(0, 1) * py + r(0, 2)) * d + tt(0)
    qy = (r(1, 0) * px + r(1, 1) * py + r(1, 2)) * d + tt(1)
    qz = (r(2, 0) * px + r(2, 1) * py + r(2, 2)) * d + tt(2)
    den = qz + 1e-8
    u = jnp.nan_to_num(qx / den, nan=0.0, posinf=float(W - 1), neginf=0.0)
    v = jnp.nan_to_num(qy / den, nan=0.0, posinf=float(H - 1), neginf=0.0)
    x0 = jnp.floor(jnp.clip(u, 0.0, W - 1.0))
    y0 = jnp.floor(jnp.clip(v, 0.0, H - 1.0))
    y1 = jnp.minimum(y0 + 1.0, H - 1.0)
    i00 = (y0 * W + x0).astype(jnp.int32).reshape(B, num_pt, TP)
    i10 = (y1 * W + x0).astype(jnp.int32).reshape(B, num_pt, TP)
    slack = W + 2          # absorbs any +-1 host/kernel rounding difference
    nchunks = HW_pad // _LANE
    lo_c = jnp.clip((i00.min(axis=-1) - slack) // _LANE, 0, nchunks - 1)
    hi_c = jnp.clip((i10.max(axis=-1) + 1 + slack) // _LANE, 0, nchunks - 1)
    return jnp.stack([lo_c, hi_c], axis=-1).reshape(-1).astype(jnp.int32)


@functools.partial(jax.jit, static_argnames=("is_mask",))
def depth_projector(depth, inv_K, T, K, img, *, is_mask=False):
    """JAX/Pallas equivalent of DepthProjector.forward.

    depth: (B,1,H,W); inv_K, T, K: (B,4,4); img: (B,C,H,W).
    Returns (warped_img (B,C,H,W), mask (B,1,H,W) or None).
    """
    B, C, H, W = img.shape
    HW = H * W
    HW_pad = -(-HW // _LANE) * _LANE
    TP = _pick_tile(HW_pad)
    num_pt = HW_pad // TP

    params = _fold_camera(inv_K, T, K)                           # (B, 12)

    depth_flat = depth.reshape(B, 1, HW).astype(jnp.float32)
    img_flat = img.reshape(B, C, HW).astype(jnp.float32)
    if HW_pad != HW:
        depth_flat = jnp.pad(depth_flat, ((0, 0), (0, 0), (0, HW_pad - HW)),
                             constant_values=1.0)
        img_flat = jnp.pad(img_flat, ((0, 0), (0, 0), (0, HW_pad - HW)))
    img_pack = _pack_pixel_pairs(img_flat)                       # (B,C,HW_pad) u32
    bounds = _tile_bounds(params, depth_flat[:, 0, :], H, W, HW_pad, TP)

    in_specs = [
        pl.BlockSpec((1, 1, TP), lambda b, p, prm, bnd: (b, 0, p)),       # depth
        pl.BlockSpec((1, C, HW_pad), lambda b, p, prm, bnd: (b, 0, 0)),   # packed img
    ]
    warped_spec = pl.BlockSpec((1, C, TP), lambda b, p, prm, bnd: (b, 0, p))
    if is_mask:
        out_shape = (jax.ShapeDtypeStruct((B, C, HW_pad), jnp.float32),
                     jax.ShapeDtypeStruct((B, 1, HW_pad), jnp.float32))
        out_specs = (warped_spec,
                     pl.BlockSpec((1, 1, TP), lambda b, p, prm, bnd: (b, 0, p)))
    else:
        out_shape = jax.ShapeDtypeStruct((B, C, HW_pad), jnp.float32)
        out_specs = warped_spec

    grid_spec = pltpu.PrefetchScalarGridSpec(
        num_scalar_prefetch=2,                  # camera params + chunk bounds
        grid=(B, num_pt),                       # pixel tiles innermost: img is
        in_specs=in_specs,                      # DMA'd once per batch item
        out_specs=out_specs,
        scratch_shapes=[pltpu.VMEM((C, TP), jnp.uint32),
                        pltpu.VMEM((C, TP), jnp.uint32)],
    )

    kernel = functools.partial(_projector_kernel, H, W, is_mask,
                               _approx_recip_supported())
    result = pl.pallas_call(
        kernel,
        out_shape=out_shape,
        grid_spec=grid_spec,
        compiler_params=pltpu.CompilerParams(
            dimension_semantics=("parallel", "parallel"),
            vmem_limit_bytes=32 * 1024 * 1024),
    )(params.reshape(-1), bounds, depth_flat, img_pack)

    if is_mask:
        warped_flat, mask_flat = result
        mask = mask_flat[:, :, :HW].reshape(B, 1, H, W)
    else:
        warped_flat, mask = result, None
    return warped_flat[:, :, :HW].reshape(B, C, H, W), mask


def _reference_forward(depth, inv_K, T, K, img, is_mask=False):
    """Pure-JAX mirror of the PyTorch DepthProjector.forward (for testing)."""
    B, C, H, W = img.shape
    HW = H * W
    xs, ys = jnp.meshgrid(jnp.arange(W, dtype=jnp.float32),
                          jnp.arange(H, dtype=jnp.float32), indexing='xy')
    pix = jnp.concatenate([xs.reshape(1, HW), ys.reshape(1, HW),
                           jnp.ones((1, HW), jnp.float32)], axis=0)
    cam = jnp.einsum('bij,jp->bip', inv_K[:, :3, :3], pix)
    cam = depth.reshape(B, 1, HW) * cam
    cam = jnp.concatenate([cam, jnp.ones((B, 1, HW), jnp.float32)], axis=1)
    P = jnp.matmul(K, T)[:, :3, :]
    q = jnp.einsum('bij,bjp->bip', P, cam)
    uv = q[:, :2, :] / (q[:, 2:3, :] + 1e-8)
    u, v = uv[:, 0, :], uv[:, 1, :]
    un = (u / (W - 1) - 0.5) * 2.0
    vn = (v / (H - 1) - 0.5) * 2.0
    ix = jnp.clip((un + 1.0) * 0.5 * (W - 1), 0.0, W - 1.0)
    iy = jnp.clip((vn + 1.0) * 0.5 * (H - 1), 0.0, H - 1.0)
    x0 = jnp.floor(ix); y0 = jnp.floor(iy)
    wx = ix - x0; wy = iy - y0
    x0i = x0.astype(jnp.int32); y0i = y0.astype(jnp.int32)
    x1i = jnp.minimum(x0i + 1, W - 1); y1i = jnp.minimum(y0i + 1, H - 1)
    imgf = img.reshape(B, C, HW)

    def g(yi, xi):
        idx = (yi * W + xi)[:, None, :]
        return jnp.take_along_axis(imgf, jnp.broadcast_to(idx, (B, C, HW)), axis=2)

    v00, v01, v10, v11 = g(y0i, x0i), g(y0i, x1i), g(y1i, x0i), g(y1i, x1i)
    wxc, wyc = wx[:, None, :], wy[:, None, :]
    out = ((v00 * (1 - wxc) + v01 * wxc) * (1 - wyc)
           + (v10 * (1 - wxc) + v11 * wxc) * wyc).reshape(B, C, H, W)
    mask = None
    if is_mask:
        inb = (un >= -1.0) & (un <= 1.0) & (vn >= -1.0) & (vn <= 1.0)
        mask = inb.astype(jnp.float32).reshape(B, 1, H, W)
    return out, mask


if __name__ == "__main__":
    key = jax.random.PRNGKey(0)
    B, C, H, W = 2, 4, 16, 16
    k1, k2, k3 = jax.random.split(key, 3)

    depth = 1.0 + 4.0 * jax.random.uniform(k1, (B, 1, H, W), dtype=jnp.float32)

    # Smooth deterministic test image so tiny resampling-coordinate differences
    # and bf16 image quantisation map to tiny value errors.
    freq = 0.1 * jax.random.normal(k2, (C, 2), dtype=jnp.float32)
    phase = 6.2831855 * jax.random.uniform(k3, (C,), dtype=jnp.float32)
    yy, xx = jnp.meshgrid(jnp.arange(H, dtype=jnp.float32),
                          jnp.arange(W, dtype=jnp.float32), indexing='ij')
    chan = jnp.sin(freq[:, 0, None, None] * xx[None]
                   + freq[:, 1, None, None] * yy[None]
                   + phase[:, None, None])                            # (C, H, W)
    batch_scale = jnp.linspace(1.0, 0.6, B, dtype=jnp.float32).reshape(B, 1, 1, 1)
    img = (batch_scale * chan[None]).astype(jnp.float32)              # (B,C,H,W)

    # Exactly-representable pinhole intrinsics with analytic inverse.
    fx = fy = 8.0
    cxp, cyp = (W - 1) / 2.0, (H - 1) / 2.0
    K1 = jnp.array([[fx, 0.0, cxp, 0.0],
                    [0.0, fy, cyp, 0.0],
                    [0.0, 0.0, 1.0, 0.0],
                    [0.0, 0.0, 0.0, 1.0]], dtype=jnp.float32)
    inv_K1 = jnp.array([[1.0 / fx, 0.0, -cxp / fx, 0.0],
                        [0.0, 1.0 / fy, -cyp / fy, 0.0],
                        [0.0, 0.0, 1.0, 0.0],
                        [0.0, 0.0, 0.0, 1.0]], dtype=jnp.float32)
    K = jnp.broadcast_to(K1, (B, 4, 4))
    inv_K = jnp.broadcast_to(inv_K1, (B, 4, 4))
    T_id = jnp.broadcast_to(jnp.eye(4, dtype=jnp.float32), (B, 4, 4))

    # --- Test 1: identity pose, with mask ------------------------------------
    warped, mask = depth_projector(depth, inv_K, T_id, K, img, is_mask=True)
    jax.block_until_ready((warped, mask))
    warped_exp, mask_exp = _reference_forward(depth, inv_K, T_id, K, img,
                                              is_mask=True)
    assert warped.shape == (B, C, H, W) and mask.shape == (B, 1, H, W)
    err = float(jnp.max(jnp.abs(warped - warped_exp)))
    assert err < 5e-2, f"identity pose: kernel vs reference mismatch {err}"
    err_id = float(jnp.max(jnp.abs(warped - img)))
    assert err_id < 5e-2, f"identity pose: warped != input image ({err_id})"
    assert bool(jnp.all((mask == 0.0) | (mask == 1.0)))
    # Interior pixels are strictly in-bounds under the identity warp; the 1-px
    # border can legitimately flip at exactly +/-1.0 from float rounding.
    assert bool(jnp.all(mask[:, :, 1:-1, 1:-1] == 1.0))
    agree = float(jnp.mean((mask == mask_exp).astype(jnp.float32)))
    assert agree > 0.85, f"mask disagrees with reference on {1.0 - agree:.2%}"

    # --- Test 2: translated pose, no mask ------------------------------------
    T2 = T_id.at[:, 0, 3].set(0.05).at[:, 1, 3].set(-0.03)
    warped2, mask2 = depth_projector(depth, inv_K, T2, K, img, is_mask=False)
    jax.block_until_ready(warped2)
    warped2_exp, _ = _reference_forward(depth, inv_K, T2, K, img, is_mask=False)
    assert mask2 is None and warped2.shape == (B, C, H, W)
    err2 = float(jnp.max(jnp.abs(warped2 - warped2_exp)))
    assert err2 < 5e-2, f"translated pose: kernel vs reference mismatch {err2}"

    print("KERNEL_OK")
</pallas_src>

<mosaic_0001>
module attributes {stable_mosaic.version = 11 : i64} {
  func.func @_projector_kernel(%arg0: i32, %arg1: i32, %arg2: memref<24xf32, #tpu.memory_space<smem>>, %arg3: memref<4xi32, #tpu.memory_space<smem>>, %arg4: memref<1x1x256xf32, #tpu.memory_space<vmem>>, %arg5: memref<1x4x256xi32, #tpu.memory_space<vmem>>, %arg6: memref<1x4x256xf32, #tpu.memory_space<vmem>>, %arg7: memref<1x1x256xf32, #tpu.memory_space<vmem>>, %arg8: memref<4x256xi32, #tpu.memory_space<vmem>>, %arg9: memref<4x256xi32, #tpu.memory_space<vmem>>) attributes {dimension_semantics = [#tpu.dimension_semantics<parallel>, #tpu.dimension_semantics<parallel>], iteration_bounds = array<i64: 2, 1>, scalar_prefetch = 2 : i64, scratch_operands = 2 : i64, tpu.core_type = #tpu.core_type<tc>, window_params = [{transform_indices = @transform_0, window_bounds = array<i64: 1, 1, 256>}, {transform_indices = @transform_1, window_bounds = array<i64: 1, 4, 256>}, {transform_indices = @transform_2, window_bounds = array<i64: 1, 4, 256>}, {transform_indices = @transform_3, window_bounds = array<i64: 1, 1, 256>}]} {
    %0 = tpu.iota {dimensions = array<i32: 1>} : vector<1x256xi32>
    %1 = arith.sitofp %0 : vector<1x256xi32> to vector<1x256xf32>
    %c256_i32 = arith.constant 256 : i32
    %2 = arith.muli %arg1, %c256_i32 : i32
    %3 = arith.sitofp %2 : i32 to f32
    %4 = vector.broadcast %3 : f32 to vector<1x256xf32>
    %5 = arith.addf %4, %1 : vector<1x256xf32>
    %cst = arith.constant 5.000000e-01 : f32
    %6 = vector.broadcast %cst : f32 to vector<1x256xf32>
    %7 = arith.addf %5, %6 : vector<1x256xf32>
    %cst_0 = arith.constant 6.250000e-02 : f32
    %8 = vector.broadcast %cst_0 : f32 to vector<1x256xf32>
    %9 = arith.mulf %7, %8 : vector<1x256xf32>
    %10 = math.floor %9 : vector<1x256xf32>
    %cst_1 = arith.constant 1.600000e+01 : f32
    %11 = vector.broadcast %cst_1 : f32 to vector<1x256xf32>
    %12 = arith.mulf %10, %11 : vector<1x256xf32>
    %13 = arith.subf %5, %12 : vector<1x256xf32>
    %c0 = arith.constant 0 : index
    %c0_2 = arith.constant 0 : index
    %c0_3 = arith.constant 0 : index
    %14 = vector.load %arg4[%c0, %c0_2, %c0_3] : memref<1x1x256xf32, #tpu.memory_space<vmem>>, vector<1x1x256xf32>
    %15 = vector.shape_cast %14 : vector<1x1x256xf32> to vector<1x256xf32>
    %c12_i32 = arith.constant 12 : i32
    %16 = arith.muli %arg0, %c12_i32 : i32
    %c0_i32 = arith.constant 0 : i32
    %17 = arith.addi %16, %c0_i32 : i32
    %18 = arith.index_cast %17 : i32 to index
    %19 = memref.load %arg2[%18] : memref<24xf32, #tpu.memory_space<smem>>
    %c1_i32 = arith.constant 1 : i32
    %20 = arith.addi %16, %c1_i32 : i32
    %21 = arith.index_cast %20 : i32 to index
    %22 = memref.load %arg2[%21] : memref<24xf32, #tpu.memory_space<smem>>
    %c2_i32 = arith.constant 2 : i32
    %23 = arith.addi %16, %c2_i32 : i32
    %24 = arith.index_cast %23 : i32 to index
    %25 = memref.load %arg2[%24] : memref<24xf32, #tpu.memory_space<smem>>
    %c3_i32 = arith.constant 3 : i32
    %26 = arith.addi %16, %c3_i32 : i32
    %27 = arith.index_cast %26 : i32 to index
    %28 = memref.load %arg2[%27] : memref<24xf32, #tpu.memory_space<smem>>
    %c4_i32 = arith.constant 4 : i32
    %29 = arith.addi %16, %c4_i32 : i32
    %30 = arith.index_cast %29 : i32 to index
    %31 = memref.load %arg2[%30] : memref<24xf32, #tpu.memory_space<smem>>
    %c5_i32 = arith.constant 5 : i32
    %32 = arith.addi %16, %c5_i32 : i32
    %33 = arith.index_cast %32 : i32 to index
    %34 = memref.load %arg2[%33] : memref<24xf32, #tpu.memory_space<smem>>
    %c6_i32 = arith.constant 6 : i32
    %35 = arith.addi %16, %c6_i32 : i32
    %36 = arith.index_cast %35 : i32 to index
    %37 = memref.load %arg2[%36] : memref<24xf32, #tpu.memory_space<smem>>
    %c7_i32 = arith.constant 7 : i32
    %38 = arith.addi %16, %c7_i32 : i32
    %39 = arith.index_cast %38 : i32 to index
    %40 = memref.load %arg2[%39] : memref<24xf32, #tpu.memory_space<smem>>
    %c8_i32 = arith.constant 8 : i32
    %41 = arith.addi %16, %c8_i32 : i32
    %42 = arith.index_cast %41 : i32 to index
    %43 = memref.load %arg2[%42] : memref<24xf32, #tpu.memory_space<smem>>
    %c9_i32 = arith.constant 9 : i32
    %44 = arith.addi %16, %c9_i32 : i32
    %45 = arith.index_cast %44 : i32 to index
    %46 = memref.load %arg2[%45] : memref<24xf32, #tpu.memory_space<smem>>
    %c10_i32 = arith.constant 10 : i32
    %47 = arith.addi %16, %c10_i32 : i32
    %48 = arith.index_cast %47 : i32 to index
    %49 = memref.load %arg2[%48] : memref<24xf32, #tpu.memory_space<smem>>
    %c11_i32 = arith.constant 11 : i32
    %50 = arith.addi %16, %c11_i32 : i32
    %51 = arith.index_cast %50 : i32 to index
    %52 = memref.load %arg2[%51] : memref<24xf32, #tpu.memory_space<smem>>
    %53 = vector.broadcast %19 : f32 to vector<1x256xf32>
    %54 = arith.mulf %53, %13 : vector<1x256xf32>
    %55 = vector.broadcast %22 : f32 to vector<1x256xf32>
    %56 = arith.mulf %55, %10 : vector<1x256xf32>
    %57 = arith.addf %54, %56 : vector<1x256xf32>
    %58 = vector.broadcast %25 : f32 to vector<1x256xf32>
    %59 = arith.addf %57, %58 : vector<1x256xf32>
    %60 = arith.mulf %59, %15 : vector<1x256xf32>
    %61 = vector.broadcast %46 : f32 to vector<1x256xf32>
    %62 = arith.addf %60, %61 : vector<1x256xf32>
    %63 = vector.broadcast %28 : f32 to vector<1x256xf32>
    %64 = arith.mulf %63, %13 : vector<1x256xf32>
    %65 = vector.broadcast %31 : f32 to vector<1x256xf32>
    %66 = arith.mulf %65, %10 : vector<1x256xf32>
    %67 = arith.addf %64, %66 : vector<1x256xf32>
    %68 = vector.broadcast %34 : f32 to vector<1x256xf32>
    %69 = arith.addf %67, %68 : vector<1x256xf32>
    %70 = arith.mulf %69, %15 : vector<1x256xf32>
    %71 = vector.broadcast %49 : f32 to vector<1x256xf32>
    %72 = arith.addf %70, %71 : vector<1x256xf32>
    %73 = vector.broadcast %37 : f32 to vector<1x256xf32>
    %74 = arith.mulf %73, %13 : vector<1x256xf32>
    %75 = vector.broadcast %40 : f32 to vector<1x256xf32>
    %76 = arith.mulf %75, %10 : vector<1x256xf32>
    %77 = arith.addf %74, %76 : vector<1x256xf32>
    %78 = vector.broadcast %43 : f32 to vector<1x256xf32>
    %79 = arith.addf %77, %78 : vector<1x256xf32>
    %80 = arith.mulf %79, %15 : vector<1x256xf32>
    %81 = vector.broadcast %52 : f32 to vector<1x256xf32>
    %82 = arith.addf %80, %81 : vector<1x256xf32>
    %cst_4 = arith.constant 9.99999993E-9 : f32
    %83 = vector.broadcast %cst_4 : f32 to vector<1x256xf32>
    %84 = arith.addf %82, %83 : vector<1x256xf32>
    %85 = tpu.reciprocal %84 {approx = true} : vector<1x256xf32> -> vector<1x256xf32>
    %86 = arith.mulf %84, %85 : vector<1x256xf32>
    %cst_5 = arith.constant 2.000000e+00 : f32
    %87 = vector.broadcast %cst_5 : f32 to vector<1x256xf32>
    %88 = arith.subf %87, %86 : vector<1x256xf32>
    %89 = arith.mulf %85, %88 : vector<1x256xf32>
    %90 = arith.mulf %62, %89 : vector<1x256xf32>
    %91 = arith.mulf %72, %89 : vector<1x256xf32>
    %cst_6 = arith.constant 0.000000e+00 : f32
    %92 = vector.broadcast %cst_6 : f32 to vector<1x256xf32>
    %93 = arith.cmpf oge, %90, %92 : vector<1x256xf32>
    %cst_7 = arith.constant 1.500000e+01 : f32
    %94 = vector.broadcast %cst_7 : f32 to vector<1x256xf32>
    %95 = arith.cmpf ole, %90, %94 : vector<1x256xf32>
    %96 = arith.andi %93, %95 : vector<1x256xi1>
    %cst_8 = arith.constant 0.000000e+00 : f32
    %97 = vector.broadcast %cst_8 : f32 to vector<1x256xf32>
    %98 = arith.cmpf oge, %91, %97 : vector<1x256xf32>
    %99 = arith.andi %96, %98 : vector<1x256xi1>
    %cst_9 = arith.constant 1.500000e+01 : f32
    %100 = vector.broadcast %cst_9 : f32 to vector<1x256xf32>
    %101 = arith.cmpf ole, %91, %100 : vector<1x256xf32>
    %102 = arith.andi %99, %101 : vector<1x256xi1>
    %103 = arith.extui %102 : vector<1x256xi1> to vector<1x256xi32>
    %104 = arith.sitofp %103 : vector<1x256xi32> to vector<1x256xf32>
    %c0_10 = arith.constant 0 : index
    %c0_11 = arith.constant 0 : index
    %c0_12 = arith.constant 0 : index
    %105 = vector.load %arg7[%c0_10, %c0_11, %c0_12] : memref<1x1x256xf32, #tpu.memory_space<vmem>>, vector<1x1x256xf32>
    %106 = vector.shape_cast %105 : vector<1x1x256xf32> to vector<1x256xf32>
    %107 = vector.shape_cast %104 : vector<1x256xf32> to vector<1x1x256xf32>
    tpu.vector_store %arg7[%c0_10, %c0_11, %c0_12], %107 {strides = array<i32>} : memref<1x1x256xf32, #tpu.memory_space<vmem>>, vector<1x1x256xf32>,
    %cst_13 = arith.constant 0.000000e+00 : f32
    %cst_14 = arith.constant 1.500000e+01 : f32
    %108 = vector.broadcast %cst_13 : f32 to vector<1x256xf32>
    %109 = arith.maximumf %108, %90 : vector<1x256xf32>
    %110 = vector.broadcast %cst_14 : f32 to vector<1x256xf32>
    %111 = arith.minimumf %110, %109 : vector<1x256xf32>
    %cst_15 = arith.constant 0.000000e+00 : f32
    %cst_16 = arith.constant 1.500000e+01 : f32
    %112 = vector.broadcast %cst_15 : f32 to vector<1x256xf32>
    %113 = arith.maximumf %112, %91 : vector<1x256xf32>
    %114 = vector.broadcast %cst_16 : f32 to vector<1x256xf32>
    %115 = arith.minimumf %114, %113 : vector<1x256xf32>
    %116 = math.floor %111 : vector<1x256xf32>
    %117 = math.floor %115 : vector<1x256xf32>
    %118 = arith.subf %111, %116 : vector<1x256xf32>
    %119 = arith.subf %115, %117 : vector<1x256xf32>
    %120 = arith.fptosi %116 : vector<1x256xf32> to vector<1x256xi32>
    %121 = arith.fptosi %117 : vector<1x256xf32> to vector<1x256xi32>
    %c1_i32_17 = arith.constant 1 : i32
    %122 = vector.broadcast %c1_i32_17 : i32 to vector<1x256xi32>
    %123 = arith.addi %121, %122 : vector<1x256xi32>
    %c15_i32 = arith.constant 15 : i32
    %124 = vector.broadcast %c15_i32 : i32 to vector<1x256xi32>
    %125 = arith.minsi %123, %124 : vector<1x256xi32>
    %c16_i32 = arith.constant 16 : i32
    %126 = vector.broadcast %c16_i32 : i32 to vector<1x256xi32>
    %127 = arith.muli %121, %126 : vector<1x256xi32>
    %128 = arith.addi %127, %120 : vector<1x256xi32>
    %129 = vector.shape_cast %128 : vector<1x256xi32> to vector<1x256xi32>
    %130 = vector.broadcast %129 : vector<1x256xi32> to vector<4x256xi32>
    %c16_i32_18 = arith.constant 16 : i32
    %131 = vector.broadcast %c16_i32_18 : i32 to vector<1x256xi32>
    %132 = arith.muli %125, %131 : vector<1x256xi32>
    %133 = arith.addi %132, %120 : vector<1x256xi32>
    %134 = vector.shape_cast %133 : vector<1x256xi32> to vector<1x256xi32>
    %135 = vector.broadcast %134 : vector<1x256xi32> to vector<4x256xi32>
    %c1_i32_19 = arith.constant 1 : i32
    %136 = arith.muli %arg0, %c1_i32_19 : i32
    %137 = arith.addi %136, %arg1 : i32
    %c2_i32_20 = arith.constant 2 : i32
    %138 = arith.muli %137, %c2_i32_20 : i32
    %c0_i32_21 = arith.constant 0 : i32
    %139 = arith.addi %138, %c0_i32_21 : i32
    %140 = arith.index_cast %139 : i32 to index
    %141 = memref.load %arg3[%140] : memref<4xi32, #tpu.memory_space<smem>>
    %c1_i32_22 = arith.constant 1 : i32
    %142 = arith.addi %138, %c1_i32_22 : i32
    %143 = arith.index_cast %142 : i32 to index
    %144 = memref.load %arg3[%143] : memref<4xi32, #tpu.memory_space<smem>>
    %c0_i32_23 = arith.constant 0 : i32
    %145 = vector.broadcast %c0_i32_23 : i32 to vector<4x256xi32>
    %c0_24 = arith.constant 0 : index
    %c0_25 = arith.constant 0 : index
    %146 = vector.load %arg8[%c0_24, %c0_25] : memref<4x256xi32, #tpu.memory_space<vmem>>, vector<4x256xi32>
    tpu.vector_store %arg8[%c0_24, %c0_25], %145 {strides = array<i32>} : memref<4x256xi32, #tpu.memory_space<vmem>>, vector<4x256xi32>,
    %c0_i32_26 = arith.constant 0 : i32
    %147 = vector.broadcast %c0_i32_26 : i32 to vector<4x256xi32>
    %c0_27 = arith.constant 0 : index
    %c0_28 = arith.constant 0 : index
    %148 = vector.load %arg9[%c0_27, %c0_28] : memref<4x256xi32, #tpu.memory_space<vmem>>, vector<4x256xi32>
    tpu.vector_store %arg9[%c0_27, %c0_28], %147 {strides = array<i32>} : memref<4x256xi32, #tpu.memory_space<vmem>>, vector<4x256xi32>,
    %149 = arith.subi %144, %141 : i32
    %c1_i32_29 = arith.constant 1 : i32
    %150 = arith.addi %149, %c1_i32_29 : i32
    %c0_i32_30 = arith.constant 0 : i32
    %151 = arith.subi %150, %c0_i32_30 : i32
    %c1_i32_31 = arith.constant 1 : i32
    %c1_i32_32 = arith.constant 1 : i32
    %152 = arith.subi %c1_i32_31, %c1_i32_32 : i32
    %153 = arith.addi %151, %152 : i32
    %c1_i32_33 = arith.constant 1 : i32
    %154 = arith.divsi %153, %c1_i32_33 : i32
    %c1_i32_34 = arith.constant 1 : i32
    %c0_i32_35 = arith.constant 0 : i32
    %c0_i32_36 = arith.constant 0 : i32
    %155 = arith.subi %154, %c0_i32_36 : i32
    %156 = arith.addi %c0_i32_36, %155 : i32
    %c1_i32_37 = arith.constant 1 : i32
    scf.for %arg10 = %c0_i32_36 to %156 step %c1_i32_37  : i32 {
      %186 = arith.muli %arg10, %c1_i32_34 : i32
      %187 = arith.addi %c0_i32_35, %186 : i32
      %188 = arith.addi %141, %187 : i32
      %c128_i32 = arith.constant 128 : i32
      %189 = arith.muli %188, %c128_i32 : i32
      %190 = tpu.assume_multiple %189, 128 : i32
      %c0_48 = arith.constant 0 : index
      %c0_49 = arith.constant 0 : index
      %191 = arith.index_cast %190 : i32 to index
      %192 = vector.load %arg5[%c0_48, %c0_49, %191] : memref<1x4x256xi32, #tpu.memory_space<vmem>>, vector<1x4x128xi32>
      %193 = vector.shape_cast %192 : vector<1x4x128xi32> to vector<4x128xi32>
      %194 = vector.broadcast %190 : i32 to vector<4x256xi32>
      %195 = arith.subi %130, %194 : vector<4x256xi32>
      %196 = vector.broadcast %190 : i32 to vector<4x256xi32>
      %197 = arith.subi %135, %196 : vector<4x256xi32>
      %c0_i32_50 = arith.constant 0 : i32
      %c127_i32 = arith.constant 127 : i32
      %198 = vector.broadcast %c0_i32_50 : i32 to vector<4x256xi32>
      %199 = arith.maxsi %198, %195 : vector<4x256xi32>
      %200 = vector.broadcast %c127_i32 : i32 to vector<4x256xi32>
      %201 = arith.minsi %200, %199 : vector<4x256xi32>
      %c0_i32_51 = arith.constant 0 : i32
      %202 = vector.broadcast %c0_i32_51 : i32 to vector<4x256xi32>
      %203 = arith.cmpi slt, %201, %202 : vector<4x256xi32>
      %c128_i32_52 = arith.constant 128 : i32
      %204 = vector.broadcast %c128_i32_52 : i32 to vector<4x256xi32>
      %205 = arith.addi %201, %204 : vector<4x256xi32>
      %206 = arith.select %203, %205, %201 : vector<4x256xi1>, vector<4x256xi32>
      %207 = vector.shape_cast %206 : vector<4x256xi32> to vector<4x256x1xi32>
      %208 = vector.shape_cast %207 : vector<4x256x1xi32> to vector<4x256xi32>
      %209 = tpu.dynamic_gather %193[%208] in [1] : vector<4x128xi32>, vector<4x256xi32> -> vector<4x256xi32>
      %c0_i32_53 = arith.constant 0 : i32
      %c127_i32_54 = arith.constant 127 : i32
      %210 = vector.broadcast %c0_i32_53 : i32 to vector<4x256xi32>
      %211 = arith.maxsi %210, %197 : vector<4x256xi32>
      %212 = vector.broadcast %c127_i32_54 : i32 to vector<4x256xi32>
      %213 = arith.minsi %212, %211 : vector<4x256xi32>
      %c0_i32_55 = arith.constant 0 : i32
      %214 = vector.broadcast %c0_i32_55 : i32 to vector<4x256xi32>
      %215 = arith.cmpi slt, %213, %214 : vector<4x256xi32>
      %c128_i32_56 = arith.constant 128 : i32
      %216 = vector.broadcast %c128_i32_56 : i32 to vector<4x256xi32>
      %217 = arith.addi %213, %216 : vector<4x256xi32>
      %218 = arith.select %215, %217, %213 : vector<4x256xi1>, vector<4x256xi32>
      %219 = vector.shape_cast %218 : vector<4x256xi32> to vector<4x256x1xi32>
      %220 = vector.shape_cast %219 : vector<4x256x1xi32> to vector<4x256xi32>
      %221 = tpu.dynamic_gather %193[%220] in [1] : vector<4x128xi32>, vector<4x256xi32> -> vector<4x256xi32>
      %c0_i32_57 = arith.constant 0 : i32
      %222 = vector.broadcast %c0_i32_57 : i32 to vector<4x256xi32>
      %223 = arith.cmpi sge, %195, %222 : vector<4x256xi32>
      %c128_i32_58 = arith.constant 128 : i32
      %224 = vector.broadcast %c128_i32_58 : i32 to vector<4x256xi32>
      %225 = arith.cmpi slt, %195, %224 : vector<4x256xi32>
      %226 = arith.andi %223, %225 : vector<4x256xi1>
      %c0_59 = arith.constant 0 : index
      %c0_60 = arith.constant 0 : index
      %227 = vector.load %arg8[%c0_59, %c0_60] : memref<4x256xi32, #tpu.memory_space<vmem>>, vector<4x256xi32>
      %228 = arith.select %226, %209, %227 : vector<4x256xi1>, vector<4x256xi32>
      %c0_61 = arith.constant 0 : index
      %c0_62 = arith.constant 0 : index
      %229 = vector.load %arg8[%c0_61, %c0_62] : memref<4x256xi32, #tpu.memory_space<vmem>>, vector<4x256xi32>
      tpu.vector_store %arg8[%c0_61, %c0_62], %228 {strides = array<i32>} : memref<4x256xi32, #tpu.memory_space<vmem>>, vector<4x256xi32>,
      %c0_i32_63 = arith.constant 0 : i32
      %230 = vector.broadcast %c0_i32_63 : i32 to vector<4x256xi32>
      %231 = arith.cmpi sge, %197, %230 : vector<4x256xi32>
      %c128_i32_64 = arith.constant 128 : i32
      %232 = vector.broadcast %c128_i32_64 : i32 to vector<4x256xi32>
      %233 = arith.cmpi slt, %197, %232 : vector<4x256xi32>
      %234 = arith.andi %231, %233 : vector<4x256xi1>
      %c0_65 = arith.constant 0 : index
      %c0_66 = arith.constant 0 : index
      %235 = vector.load %arg9[%c0_65, %c0_66] : memref<4x256xi32, #tpu.memory_space<vmem>>, vector<4x256xi32>
      %236 = arith.select %234, %221, %235 : vector<4x256xi1>, vector<4x256xi32>
      %c0_67 = arith.constant 0 : index
      %c0_68 = arith.constant 0 : index
      %237 = vector.load %arg9[%c0_67, %c0_68] : memref<4x256xi32, #tpu.memory_space<vmem>>, vector<4x256xi32>
      tpu.vector_store %arg9[%c0_67, %c0_68], %236 {strides = array<i32>} : memref<4x256xi32, #tpu.memory_space<vmem>>, vector<4x256xi32>,
    }
    %c0_38 = arith.constant 0 : index
    %c0_39 = arith.constant 0 : index
    %157 = vector.load %arg8[%c0_38, %c0_39] : memref<4x256xi32, #tpu.memory_space<vmem>>, vector<4x256xi32>
    %c16_i32_40 = arith.constant 16 : i32
    %158 = vector.broadcast %c16_i32_40 : i32 to vector<4x256xi32>
    %159 = arith.shli %157, %158 : vector<4x256xi32>
    %160 = tpu.bitcast %159 : vector<4x256xi32> -> vector<4x256xf32>
    %c-65536_i32 = arith.constant -65536 : i32
    %161 = vector.broadcast %c-65536_i32 : i32 to vector<4x256xi32>
    %162 = arith.andi %157, %161 : vector<4x256xi32>
    %163 = tpu.bitcast %162 : vector<4x256xi32> -> vector<4x256xf32>
    %c0_41 = arith.constant 0 : index
    %c0_42 = arith.constant 0 : index
    %164 = vector.load %arg9[%c0_41, %c0_42] : memref<4x256xi32, #tpu.memory_space<vmem>>, vector<4x256xi32>
    %c16_i32_43 = arith.constant 16 : i32
    %165 = vector.broadcast %c16_i32_43 : i32 to vector<4x256xi32>
    %166 = arith.shli %164, %165 : vector<4x256xi32>
    %167 = tpu.bitcast %166 : vector<4x256xi32> -> vector<4x256xf32>
    %c-65536_i32_44 = arith.constant -65536 : i32
    %168 = vector.broadcast %c-65536_i32_44 : i32 to vector<4x256xi32>
    %169 = arith.andi %164, %168 : vector<4x256xi32>
    %170 = tpu.bitcast %169 : vector<4x256xi32> -> vector<4x256xf32>
    %171 = arith.subf %163, %160 : vector<4x256xf32>
    %172 = vector.broadcast %118 : vector<1x256xf32> to vector<4x256xf32>
    %173 = arith.mulf %171, %172 : vector<4x256xf32>
    %174 = arith.addf %160, %173 : vector<4x256xf32>
    %175 = arith.subf %170, %167 : vector<4x256xf32>
    %176 = vector.broadcast %118 : vector<1x256xf32> to vector<4x256xf32>
    %177 = arith.mulf %175, %176 : vector<4x256xf32>
    %178 = arith.addf %167, %177 : vector<4x256xf32>
    %179 = arith.subf %178, %174 : vector<4x256xf32>
    %180 = vector.broadcast %119 : vector<1x256xf32> to vector<4x256xf32>
    %181 = arith.mulf %179, %180 : vector<4x256xf32>
    %182 = arith.addf %174, %181 : vector<4x256xf32>
    %c0_45 = arith.constant 0 : index
    %c0_46 = arith.constant 0 : index
    %c0_47 = arith.constant 0 : index
    %183 = vector.load %arg6[%c0_45, %c0_46, %c0_47] : memref<1x4x256xf32, #tpu.memory_space<vmem>>, vector<1x4x256xf32>
    %184 = vector.shape_cast %183 : vector<1x4x256xf32> to vector<4x256xf32>
    %185 = vector.shape_cast %182 : vector<4x256xf32> to vector<1x4x256xf32>
    tpu.vector_store %arg6[%c0_45, %c0_46, %c0_47], %185 {strides = array<i32>} : memref<1x4x256xf32, #tpu.memory_space<vmem>>, vector<1x4x256xf32>,
    return
  }
  func.func @transform_0(%arg0: i32, %arg1: i32, %arg2: memref<24xf32, #tpu.memory_space<smem>>, %arg3: memref<4xi32, #tpu.memory_space<smem>>) -> (i32, i32, i32) {
    %c0_i32 = arith.constant 0 : i32
    %c0_i32_0 = arith.constant 0 : i32
    return %arg0, %c0_i32, %arg1 : i32, i32, i32
  }
  func.func @transform_1(%arg0: i32, %arg1: i32, %arg2: memref<24xf32, #tpu.memory_space<smem>>, %arg3: memref<4xi32, #tpu.memory_space<smem>>) -> (i32, i32, i32) {
    %c0_i32 = arith.constant 0 : i32
    %c0_i32_0 = arith.constant 0 : i32
    %c0_i32_1 = arith.constant 0 : i32
    return %arg0, %c0_i32, %c0_i32_0 : i32, i32, i32
  }
  func.func @transform_2(%arg0: i32, %arg1: i32, %arg2: memref<24xf32, #tpu.memory_space<smem>>, %arg3: memref<4xi32, #tpu.memory_space<smem>>) -> (i32, i32, i32) {
    %c0_i32 = arith.constant 0 : i32
    %c0_i32_0 = arith.constant 0 : i32
    return %arg0, %c0_i32, %arg1 : i32, i32, i32
  }
  func.func @transform_3(%arg0: i32, %arg1: i32, %arg2: memref<24xf32, #tpu.memory_space<smem>>, %arg3: memref<4xi32, #tpu.memory_space<smem>>) -> (i32, i32, i32) {
    %c0_i32 = arith.constant 0 : i32
    %c0_i32_0 = arith.constant 0 : i32
    return %arg0, %c0_i32, %arg1 : i32, i32, i32
  }
}

</mosaic_0001>

<bundles_post_ra>
// kernel: depth_projector.1
= control target key start
LH: loop header
LB: loop body
LE: loop exit
PB: predicated region body
PF: predicated region fallthrough
CT: control target
= control target key end

     0   :  { %s1122_s0 = inlined_call_operand.vmem [shape: f32[24], index: 0, kind: input, shape index: {}]   ;;  %s1123_s2 = inlined_call_operand.vmem [shape: f32[2,1,256], index: 2, kind: input, shape index: {}]   ;;  %s1124_s3 = inlined_call_operand.vmem [shape: u32[2,4,256], index: 3, kind: input, shape index: {}]   ;;  %s1125_s4 = inlined_call_operand.vmem [shape: f32[2,4,256], index: 4, kind: output, shape index: {0}]   ;;  %s1126_s5 = inlined_call_operand.vmem [shape: f32[2,1,256], index: 5, kind: output, shape index: {1}]   ;;  %s1127_s1 = inlined_call_operand.vmem [shape: s32[4], index: 1, kind: input, shape index: {}]  }
   0x1   :  { %s11_s20 = sshll.u32 %s1122_s0, 4  ;;  %s15_s23 = sshll.u32 %s1127_s1, 4  ;;  %s12_s20 = int_to_ptr.vmem [resolvable:$true] %s11_s20  ;;  %s16_s23 = int_to_ptr.vmem [resolvable:$true] %s15_s23 }
   0x2   :  { %s842_s24 = scalar_lea.vmem %s12_s20, 16  ;;  %p847_p1 = scmp.lt.s32.totalorder %s12_s20, %s12_s20 }
   0x3   :  { %p843_p0 = scmp.ne.s32.totalorder %s12_s20, %s842_s24  ;;  %p848_p2 = scmp.lt.s32.totalorder %s842_s24, %s842_s24 }
   0x5   :  { %p849_p3 = por %p848_p2, %p847_p1 }
   0x7   :  { %p850_p4 = pnand %p849_p3, %p843_p0 }
   0x9   :  { %853 = shalt.err (!%p850_p4)  }
   0xa   :  { %s900_s25 = smov [#allocation5]   ;;  %s854_s26 = scalar_lea.vmem %s16_s23, 16 }
   0xb   :  { %14 = dma.vmem_to_smem %s12_s20, 16, %s900_s25, [#allocation4] }
   0xc   :  { %p855_p5 = scmp.ne.s32.totalorder %s16_s23, %s854_s26  ;;  %p859_p6 = scmp.lt.s32.totalorder %s16_s23, %s16_s23 }
   0xd   :  { %p860_p7 = scmp.lt.s32.totalorder %s854_s26, %s854_s26 }
   0xf   :  { %p861_p8 = por %p860_p7, %p859_p6 }
  0x11   :  { %p862_p9 = pnand %p861_p8, %p855_p5 }
  0x13   :  { %865 = shalt.err (!%p862_p9)  }
  0x14   :  { %s901_s0 = smov [#allocation6]  }
  0x15   :  { %18 = dma.vmem_to_smem %s16_s23, 16, %s901_s0, [#allocation4] }
  0x16   :  { %882 = dma.done.wait [#allocation4], 32 }
  0x17   :  { %883 = vsyncadd [#allocation4], 4294967264 }
  0x18   :  { %20 = sfence }
  0x19   :  { %s941_s1 = smov 0   ;;  %s943_s27 = smov 0  }
  0x1a   :  { %s945_s28 = smov 0  }
  0x1b LB: > { %s38_s29 = sadd.s32 1, %s890_s27  ;;  %p769_p10 = scmp.ge.s32.totalorder %s894_s28, 1  ;;  %s894_s28 = sphi %s945_s28, %s26_s28   ;;  %s890_s27 = sphi %s943_s27, %s1131_s27   ;;  %s886_s1 = sphi %s941_s1, %s1130_s1  }
  0x1c   : > { %p40_p11 = scmp.ge.s32.totalorder %s38_s29, 2  ;;  %p184_p12 = scmp.lt.s32.totalorder %s894_s28, 3 }
  0x1e   : > { %s1133_s29 = smov (%p40_p11, %s38_s29), 0  ;;  %p185_p13 = pnand %p769_p10, %p184_p12 }
  0x1f   : > { %p229_p0 = scmp.lt.s32.totalorder (!%p185_p13), %s886_s1, 1  ;;  %s978_s13 = smul.u32 (!%p185_p13), 12, %s886_s1 }
  0x20   : > { %188 = sbr.rel (%p185_p13) target bundleno = 287 (0x11f), region = 28  ;;  %s778_s21 = sshll.u32 (!%p185_p13), %s886_s1, 1 }
  0x21   : > { %s294_s15 = sadd.s32 (!%p185_p13), 6, %s978_s13  ;;  %s296_s17 = sadd.s32 (!%p185_p13), 7, %s978_s13 }
  0x22   : > { %s295_s16 = sld [smem:[#allocation5 + %s294_s15]] (!%p185_p13)  ;;  %s298_s19 = sadd.s32 (!%p185_p13), 8, %s978_s13 }
  0x23   : > { %s297_s18 = sld [smem:[#allocation5 + %s296_s17]] (!%p185_p13)  ;;  %s284_s23 = sadd.s32 (!%p185_p13), 1, %s978_s13 }
  0x24   : > { %s990_s20 = sld [smem:[#allocation5 + %s298_s19]] (!%p185_p13)  ;;  %s304_s0 = sadd.s32 (!%p185_p13), 11, %s978_s13 }
  0x25   : > { %v261_v0 = vlaneseq  ;;  %v902_v1 = vmov 0   ;;  %s963_s30 = scalar_select %p229_p0, %s886_s1, 1 }
  0x26   : > { %475 = vst [vmem:[#allocation2] sm:$0xff] %v902_v1  ;;  %476 = vst [vmem:[#allocation3] sm:$0xff] %v902_v1  ;;  %s997_s22 = sld [smem:[#allocation5 + %s978_s13]]  ;;  %s473_s7 = sadd.s32 1, %s778_s21 }
  0x27   : > { %v262_v2 = vand.u32 127, %v261_v0  ;;  %s784_s6 = sshll.u32 %s963_s30, 3  ;;  %s770_s14 = sshll.u32 %s963_s30, 1  ;;  %v993_v14 = vshrl.u32 %v261_v0, 7  ;;  %vm417_vm14 = vcmp.lt.s32.totalorder %v261_v0, 256 }
  0x28   : > { %s970_s9 = scalar_lea.vmem %s1124_s3, %s784_s6  ;;  %s975_s12 = scalar_lea.vmem %s1125_s4, %s784_s6  ;;  %v349_v18 = vstv %s295_s16 }
  0x29   : > { %v263_v3 = vadd.s32 128, %v262_v2  ;;  %v264_v4 = vcvt.s32.f32 %v262_v2  ;;  %s235_s26 = scalar_lea.vmem %s1123_s2, %s770_s14  ;;  %s1006_s6 = sld [smem:[#allocation5 + %s304_s0]]  ;;  %v1010_v17 = vsub.s32 0, %v993_v14  ;;  %v324_v19 = vsub.s32 1, %v993_v14 }
  0x2a   : > { %s288_s8 = sadd.s32 3, %s978_s13  ;;  %s1012_s1 = sld [smem:[#allocation6 + %s778_s21]]  ;;  %v352_v22 = vstv %s297_s18  ;;  %v281_v23 = vld [vmem:[%s235_s26] sm:$0x3]  ;;  %v357_v26 = vstv %s990_s20 }
  0x2b   : > { %v265_v5 = vcvt.s32.f32 %v263_v3  ;;  %v271_v6 = vadd.f32 0.5, %v264_v4  ;;  %s290_s10 = sadd.s32 4, %s978_s13  ;;  %s474_s11 = sld [smem:[#allocation6 + %s473_s7]]  ;;  %v321_v27 = vrot.slane %v281_v23, %v1010_v17  ;;  %v325_v28 = vrot.slane %v281_v23, %v324_v19 }
  0x2c   : > { %s285_s15 = sld [smem:[#allocation5 + %s284_s23]]  ;;  %s286_s19 = sadd.s32 2, %s978_s13  ;;  %v306_v39 = vstv %s997_s22 }
  0x2d   : > { %v272_v7 = vadd.f32 0.5, %v265_v5  ;;  %v273_v8 = vmul.f32 0.0625, %v271_v6  ;;  %s1017_s17 = sld [smem:[#allocation5 + %s288_s8]]  ;;  %s292_s23 = sadd.s32 5, %s978_s13 }
  0x2e   : > { %s1020_s16 = sld [smem:[#allocation5 + %s290_s10]]  ;;  %s300_s25 = sadd.s32 9, %s978_s13 }
  0x2f   : > { %v274_v9 = vmul.f32 0.0625, %v272_v7  ;;  %v980_v10 = vfloor.f32 %v273_v8  ;;  %v362_v33 = vstv %s1006_s6  ;;  %s1030_s24 = sld [smem:[#allocation5 + %s286_s19]]  ;;  %s302_s22 = sadd.s32 10, %s978_s13 }
  0x30   : > { %s293_s20 = sld [smem:[#allocation5 + %s292_s23]]  ;;  %s259_s7 = scalar_lea.vmem %s1126_s5, %s770_s14 }
  0x31   : > { %v984_v11 = vfloor.f32 %v274_v9  ;;  %v277_v12 = vmul.f32 16.0, %v980_v10  ;;  %v353_v24 = vmul.f32 %v352_v22, %v980_v10  ;;  %s477_s18 = ssub.s32 %s474_s11, %s1012_s1  ;;  %s301_s26 = sld [smem:[#allocation5 + %s300_s25]] }
  0x32   : > { %s1027_s21 = sadd.s32 1, %s477_s18  ;;  %v309_v36 = vstv %s285_s15  ;;  %s303_s0 = sld [smem:[#allocation5 + %s302_s22]] }
  0x33   : > { %v278_v13 = vmul.f32 16.0, %v984_v11  ;;  %v279_v15 = vsub.f32 %v264_v4, %v277_v12  ;;  %v354_v25 = vmul.f32 %v352_v22, %v984_v11  ;;  %v333_v40 = vstv %s1017_s17  ;;  %p779_p1 = scmp.le.s32.totalorder %s1027_s21, 0 }
  0x34   : > { %v336_v41 = vstv %s1020_s16  ;;  %v310_v44 = vmul.f32 %v309_v36, %v980_v10  ;;  %v311_v45 = vmul.f32 %v309_v36, %v984_v11  ;;  %s1074_s30 = smov (!%p779_p1), 0  }
  0x35   : > { %v280_v16 = vsub.f32 %v265_v5, %v278_v13  ;;  %v350_v20 = vmul.f32 %v349_v18, %v279_v15  ;;  %v307_v46 = vmul.f32 %v306_v39, %v279_v15  ;;  %v334_v47 = vmul.f32 %v333_v40, %v279_v15 }
  0x36   : > { %v337_v48 = vmul.f32 %v336_v41, %v980_v10  ;;  %v338_v51 = vmul.f32 %v336_v41, %v984_v11  ;;  %v314_v55 = vstv %s1030_s24  ;;  %v341_v57 = vstv %s293_s20 }
  0x37   : > { %v351_v21 = vmul.f32 %v349_v18, %v280_v16  ;;  %v355_v29 = vadd.f32 %v353_v24, %v350_v20  ;;  %v308_v49 = vmul.f32 %v306_v39, %v280_v16  ;;  %v335_v50 = vmul.f32 %v333_v40, %v280_v16 }
  0x38   : > { %v312_v52 = vadd.f32 %v310_v44, %v307_v46  ;;  %v339_v53 = vadd.f32 %v337_v48, %v334_v47  ;;  %v330_v3 = vstv %s301_s26  ;;  %v346_v5 = vstv %s303_s0 }
  0x39   : > { %v356_v30 = vadd.f32 %v354_v25, %v351_v21  ;;  %v358_v31 = vadd.f32 %v357_v26, %v355_v29  ;;  %v313_v54 = vadd.f32 %v311_v45, %v308_v49  ;;  %v340_v56 = vadd.f32 %v338_v51, %v335_v50 }
  0x3a   : > { %v315_v58 = vadd.f32 %v314_v55, %v312_v52  ;;  %v342_v59 = vadd.f32 %v341_v57, %v339_v53  ;;  %v903_v18 = vmov 1966171168  }
  0x3b   : > { %v359_v32 = vadd.f32 %v357_v26, %v356_v30  ;;  %v360_v34 = vmul.f32 %v358_v31, %v321_v27  ;;  %v316_v60 = vadd.f32 %v314_v55, %v313_v54  ;;  %v343_v61 = vadd.f32 %v341_v57, %v340_v56 }
  0x3c   : > { %v328_v62 = vmul.f32 %v321_v27, %v315_v58  ;;  %v344_v63 = vmul.f32 %v342_v59, %v321_v27  ;;  %v401_v19 = vunpack.c.l.s4 %v903_v18 }
  0x3d   : > { %v361_v35 = vmul.f32 %v359_v32, %v325_v28  ;;  %v363_v37 = vadd.f32 %v362_v33, %v360_v34  ;;  %v329_v2 = vmul.f32 %v325_v28, %v316_v60  ;;  %v345_v4 = vmul.f32 %v343_v61, %v325_v28 }
  0x3e   : > { %v331_v9 = vadd.f32 %v330_v3, %v328_v62  ;;  %v347_v10 = vadd.f32 %v346_v5, %v344_v63  ;;  %v402_v25 = vunpack.c.0.s8 %v401_v19 }
  0x3f   : > { %v364_v38 = vadd.f32 %v362_v33, %v361_v35  ;;  %v365_v42 = vadd.f32 1e-08, %v363_v37  ;;  %v332_v12 = vadd.f32 %v330_v3, %v329_v2  ;;  %v348_v13 = vadd.f32 %v346_v5, %v345_v4 }
  0x40   : > { %v405_v34 = vsub.s32 %v402_v25, %v993_v14  ;;  %v904_v35 = vmov 0.0  }
  0x41   : > { %v366_v43 = vadd.f32 1e-08, %v364_v38  ;;  %831 = vrcp.f32 %v365_v42 }
  0x43   : > { %833 = vrcp.f32 %v366_v43 }
  0x4e   : > { %v832_v1 = vpop.eup %831 }
  0x4f   : > { %v369_v7 = vmul.f32 %v832_v1, %v365_v42 }
  0x50   : > { %v834_v6 = vpop.eup %833 }
  0x51   : > { %v370_v8 = vmul.f32 %v834_v6, %v366_v43  ;;  %v371_v11 = vsub.f32 2.0, %v369_v7 }
  0x53   : > { %v372_v15 = vsub.f32 2.0, %v370_v8  ;;  %v373_v16 = vmul.f32 %v832_v1, %v371_v11 }
  0x55   : > { %v374_v20 = vmul.f32 %v834_v6, %v372_v15  ;;  %v375_v21 = vmul.f32 %v373_v16, %v331_v9  ;;  %v377_v22 = vmul.f32 %v373_v16, %v347_v10 }
  0x57   : > { %v376_v23 = vmul.f32 %v374_v20, %v332_v12  ;;  %v378_v24 = vmul.f32 %v374_v20, %v348_v13  ;;  %vm379_vm0 = vcmp.ge.f32.partialorder %v375_v21, 0.0  ;;  %vm381_vm1 = vcmp.le.f32.partialorder %v375_v21, 15.0 }
  0x58   : > { %vm385_vm2 = vcmp.ge.f32.partialorder %v377_v22, 0.0  ;;  %vm383_vm5 = vmand %vm379_vm0, %vm381_vm1  ;;  %vm389_vm7 = vcmp.le.f32.partialorder %v377_v22, 15.0  ;;  %v420_v26 = vmax.f32 %v375_v21, 0.0  ;;  %v424_v28 = vmax.f32 %v377_v22, 0.0 }
  0x59   : > { %vm380_vm3 = vcmp.ge.f32.partialorder %v376_v23, 0.0  ;;  %vm382_vm4 = vcmp.le.f32.partialorder %v376_v23, 15.0  ;;  %vm386_vm6 = vcmp.ge.f32.partialorder %v378_v24, 0.0  ;;  %v421_v27 = vmax.f32 %v376_v23, 0.0  ;;  %vm387_vm9 = vmand %vm383_vm5, %vm385_vm2 }
  0x5a   : > { %vm384_vm8 = vmand %vm380_vm3, %vm382_vm4  ;;  %v425_v29 = vmax.f32 %v378_v24, 0.0  ;;  %vm390_vm10 = vcmp.le.f32.partialorder %v378_v24, 15.0  ;;  %v422_v30 = vmin.f32 %v420_v26, 15.0  ;;  %v426_v32 = vmin.f32 %v424_v28, 15.0 }
  0x5b   : > { %vm388_vm11 = vmand %vm384_vm8, %vm386_vm6  ;;  %v423_v31 = vmin.f32 %v421_v27, 15.0 }
  0x5c   : > { %v427_v33 = vmin.f32 %v425_v29, 15.0  ;;  %vm391_vm12 = vmand %vm387_vm9, %vm389_vm7  ;;  %v428_v37 = vfloor.f32 %v422_v30  ;;  %v430_v39 = vfloor.f32 %v426_v32 }
  0x5d   : > { %vm392_vm13 = vmand %vm388_vm11, %vm390_vm10  ;;  %v776_v36 = vsel %vm391_vm12, 1.0, %v904_v35  ;;  %v429_v38 = vfloor.f32 %v423_v31 }
  0x5e   : > { %v777_v40 = vsel %vm392_vm13, 1.0, %v904_v35  ;;  %v431_v41 = vfloor.f32 %v427_v33  ;;  %v1043_v43 = vsub.f32 %v422_v30, %v428_v37  ;;  %v1047_v45 = vsub.f32 %v426_v32, %v430_v39 }
  0x5f   : > { %v399_v42 = vcombine.low %v776_v36, %v777_v40  ;;  %v1045_v44 = vsub.f32 %v423_v31, %v429_v38  ;;  %v786_v47 = vtrunc.f32 %v428_v37  ;;  %v788_v14 = vtrunc.f32 %v429_v38 }
  0x60   : > { %v1049_v46 = vsub.f32 %v427_v33, %v431_v41  ;;  %v790_v48 = vtrunc.f32 %v430_v39  ;;  %v792_v50 = vtrunc.f32 %v431_v41 }
  0x61   : > { %v406_v49 = vrot.slane %v399_v42, %v405_v34  ;;  %v787_v51 = vcvt.f32.s32 %v786_v47  ;;  %v789_v54 = vcvt.f32.s32 %v788_v14 }
  0x62   : > { %v791_v52 = vcvt.f32.s32 %v790_v48  ;;  %v793_v55 = vcvt.f32.s32 %v792_v50 }
  0x63   : > { %v413_v53 = vrot.slane %v406_v49, %v405_v34 }
  0x64   : > { %v440_v56 = vadd.s32 1, %v791_v52  ;;  %v446_v57 = vmul.u32 16, %v791_v52  ;;  %v441_v58 = vadd.s32 1, %v793_v55  ;;  %v447_v59 = vmul.u32 16, %v793_v55 }
  0x65   : > { %419 = vst.msk [vmem:[%s259_s7] sm:$0x3] %vm417_vm14, %v413_v53 }
  0x66   : > { %vm442_vm15 = vcmp.lt.s32.totalorder %v440_v56, 15  ;;  %v1057_v60 = vadd.s32 %v787_v51, %v446_v57  ;;  %vm444_vm0 = vcmp.lt.s32.totalorder %v441_v58, 15  ;;  %v1059_v62 = vadd.s32 %v789_v54, %v447_v59 }
  0x67   : > { %v443_v61 = vsel %vm442_vm15, %v440_v56, 15  ;;  %v445_v63 = vsel %vm444_vm0, %v441_v58, 15 }
  0x68   : > { %v453_v0 = vrot.slane %v1057_v60, %v1010_v17  ;;  %v458_v1 = vmul.u32 16, %v443_v61  ;;  %v457_v2 = vrot.slane %v1059_v62, %v1010_v17  ;;  %v459_v3 = vmul.u32 16, %v445_v63  ;;  %718 = sbr.rel (%p779_p1) target bundleno = 261 (0x105), region = 75 }
  0x6a   : > { %v1065_v4 = vadd.s32 %v787_v51, %v458_v1  ;;  %v1067_v5 = vadd.s32 %v789_v54, %v459_v3 }
  0x6c   : > { %v465_v6 = vrot.slane %v1065_v4, %v1010_v17  ;;  %v469_v7 = vrot.slane %v1067_v5, %v1010_v17 }
  0x6d LB: >> { %s485_s14 = sadd.s32 %s898_s30, %s1012_s1  ;;  %v555_v33 = vld [vmem:[#allocation3] sm:$0xff]  ;;  %v543_v35 = vld [vmem:[#allocation2] sm:$0xff]  ;;  %s482_s30 = sadd.s32 1, %s898_s30   ;;  %s898_s30 = sphi %s1074_s30, %s482_s30  }
  0x6e   : >> { %s780_s8 = sshll.u32 %s485_s14, 7  ;;  %v556_v37 = vcombine.high %v555_v33, %v555_v33  ;;  %v544_v38 = vcombine.high %v543_v35, %v543_v35  ;;  %p481_p2 = scmp.ge.s32.totalorder %s482_s30, %s1027_s21 }
  0x6f   : >> { %v492_v8 = vstv %s780_s8  ;;  %s487_s10 = sshra.s32 %s780_s8, 7 }
  0x70   : >> { %v495_v9 = vsub.s32 %v465_v6, %v492_v8  ;;  %v493_v10 = vsub.s32 %v453_v0, %v492_v8  ;;  %v496_v11 = vsub.s32 %v469_v7, %v492_v8  ;;  %v494_v12 = vsub.s32 %v457_v2, %v492_v8  ;;  %s781_s11 = sshll.u32 %s487_s10, 2 }
  0x71   : >> { %s490_s15 = scalar_lea.vmem %s970_s9, %s781_s11 }
  0x72   : >> { %vm517_vm1 = vcmp.gt.s32.totalorder %v495_v9, 0  ;;  %vm497_vm2 = vcmp.gt.s32.totalorder %v493_v10, 0  ;;  %vm519_vm3 = vcmp.gt.s32.totalorder %v496_v11, 0  ;;  %vm499_vm4 = vcmp.gt.s32.totalorder %v494_v12, 0  ;;  %v491_v27 = vld [vmem:[%s490_s15] sm:$0xf] }
  0x73   : >> { %v518_v13 = vsel %vm517_vm1, %v495_v9, 0  ;;  %v498_v15 = vsel %vm497_vm2, %v493_v10, 0  ;;  %v520_v16 = vsel %vm519_vm3, %v496_v11, 0  ;;  %v500_v18 = vsel %vm499_vm4, %v494_v12, 0 }
  0x74   : >> { %vm521_vm5 = vcmp.lt.s32.totalorder %v518_v13, 127  ;;  %vm501_vm6 = vcmp.lt.s32.totalorder %v498_v15, 127  ;;  %vm523_vm7 = vcmp.lt.s32.totalorder %v520_v16, 127  ;;  %vm503_vm8 = vcmp.lt.s32.totalorder %v500_v18, 127 }
  0x75   : >> { %v522_v19 = vsel %vm521_vm5, %v518_v13, 127  ;;  %v502_v20 = vsel %vm501_vm6, %v498_v15, 127  ;;  %v524_v23 = vsel %vm523_vm7, %v520_v16, 127  ;;  %v504_v24 = vsel %vm503_vm8, %v500_v18, 127 }
  0x76   : >> { %vm525_vm9 = vcmp.lt.s32.totalorder %v522_v19, 0  ;;  %v527_v21 = vadd.s32 128, %v522_v19  ;;  %vm505_vm10 = vcmp.lt.s32.totalorder %v502_v20, 0  ;;  %v507_v22 = vadd.s32 128, %v502_v20 }
  0x77   : >> { %v528_v28 = vadd.s32 128, %v524_v23  ;;  %v508_v29 = vadd.s32 128, %v504_v24  ;;  %vm526_vm11 = vcmp.lt.s32.totalorder %v524_v23, 0  ;;  %vm506_vm12 = vcmp.lt.s32.totalorder %v504_v24, 0 }
  0x78   : >> { %v529_v25 = vsel %vm525_vm9, %v527_v21, %v522_v19  ;;  %v509_v26 = vsel %vm505_vm10, %v507_v22, %v502_v20  ;;  %vm549_vm13 = vcmp.ge.s32.totalorder %v495_v9, 0  ;;  %vm551_vm14 = vcmp.lt.s32.totalorder %v495_v9, 128 }
  0x79   : >> { %837 = vset.pattern.permute.xlu1 %v529_v25  ;;  %835 = vset.pattern.permute.xlu0 %v509_v26  ;;  %v530_v30 = vsel %vm526_vm11, %v528_v28, %v524_v23  ;;  %v510_v31 = vsel %vm506_vm12, %v508_v29, %v504_v24  ;;  %vm537_vm15 = vcmp.ge.s32.totalorder %v493_v10, 0  ;;  %vm539_vm0 = vcmp.lt.s32.totalorder %v493_v10, 128  ;;  %vm1094_vm3 = vmand %vm549_vm13, %vm551_vm14 }
  0x7a   : >> { %vm550_vm1 = vcmp.ge.s32.totalorder %v496_v11, 0  ;;  %vm552_vm2 = vcmp.lt.s32.totalorder %v496_v11, 128  ;;  %vm538_vm4 = vcmp.ge.s32.totalorder %v494_v12, 0  ;;  %vm540_vm5 = vcmp.lt.s32.totalorder %v494_v12, 128  ;;  %vm541_vm6 = vmand %vm537_vm15, %vm539_vm0 }
  0x7b   : >> { %vm554_vm7 = vmand %vm550_vm1, %vm552_vm2 }
  0x7c   : >> { %vm542_vm8 = vmand %vm538_vm4, %vm540_vm5 }
  0x7d   : >> { %532 = vperm.xlu1 %837, %v491_v27   ;;  %512 = vperm.xlu0 %835, %v491_v27  }
  0x81   : >> { %838 = vset.pattern.permute.xlu1 %v530_v30  ;;  %836 = vset.pattern.permute.xlu0 %v510_v31 }
  0x85   : >> { %535 = vperm.xlu1 %838, %v491_v27   ;;  %515 = vperm.xlu0 %836, %v491_v27  }
  0x89   : >> { %839 = vset.pattern.permute.xlu0 %v530_v30 }
  0xf8   : >> { %v533_v34 = vpop.permute.xlu1 %532  ;;  %v513_v36 = vpop.permute.xlu0 %512 }
  0xf9   : >> { %v557_v41 = vsel %vm1094_vm3, %v533_v34, %v555_v33  ;;  %v545_v42 = vsel %vm541_vm6, %v513_v36, %v543_v35 }
 0x100   : >> { %v536_v39 = vpop.permute.xlu1 %535  ;;  %v516_v40 = vpop.permute.xlu0 %515  ;;  %484 = sbr.rel (!%p481_p2) target bundleno = 109 (0x6d), region = 81 }
 0x101   : >> { %v558_v47 = vsel %vm554_vm7, %v536_v39, %v556_v37  ;;  %v546_v14 = vsel %vm542_vm8, %v516_v40, %v544_v38 }
 0x102   : >> { %v559_v48 = vcombine.low %v557_v41, %v558_v47  ;;  %v547_v49 = vcombine.low %v545_v42, %v546_v14 }
 0x104   : >> { %560 = vst [vmem:[#allocation3] sm:$0xff] %v559_v48  ;;  %548 = vst [vmem:[#allocation2] sm:$0xff] %v547_v49 }
 0x105 PF: > { %v584_v56 = vrot.slane %v1043_v43, %v1010_v17  ;;  %v588_v57 = vrot.slane %v1045_v44, %v1010_v17  ;;  %v604_v43 = vrot.slane %v1047_v45, %v1010_v17  ;;  %v608_v9 = vrot.slane %v1049_v46, %v1010_v17 }
 0x10b   : > { %v561_v50 = vld [vmem:[#allocation2] sm:$0xff]  ;;  %v570_v51 = vld [vmem:[#allocation3] sm:$0xff] }
 0x10c   : > { %v562_v52 = vshll.u32 %v561_v50, 16  ;;  %v566_v53 = vand.u32 4294901760, %v561_v50  ;;  %v571_v54 = vshll.u32 %v570_v51, 16  ;;  %v575_v55 = vand.u32 4294901760, %v570_v51 }
 0x10e   : > { %v563_v58 = vcombine.high %v562_v52, %v562_v52  ;;  %v567_v59 = vcombine.high %v566_v53, %v566_v53  ;;  %v572_v61 = vcombine.high %v571_v54, %v571_v54  ;;  %v576_v63 = vcombine.high %v575_v55, %v575_v55 }
 0x10f   : > { %v579_v1 = vsub.f32 %v566_v53, %v562_v52  ;;  %v593_v3 = vsub.f32 %v575_v55, %v571_v54 }
 0x110   : > { %v580_v8 = vsub.f32 %v567_v59, %v563_v58  ;;  %v594_v60 = vsub.f32 %v576_v63, %v572_v61 }
 0x111   : > { %v589_v62 = vmul.f32 %v584_v56, %v579_v1  ;;  %v595_v0 = vmul.f32 %v593_v3, %v584_v56 }
 0x112   : > { %v590_v2 = vmul.f32 %v588_v57, %v580_v8  ;;  %v596_v4 = vmul.f32 %v594_v60, %v588_v57 }
 0x113   : > { %v591_v5 = vadd.f32 %v589_v62, %v562_v52  ;;  %v597_v6 = vadd.f32 %v595_v0, %v571_v54 }
 0x114   : > { %v592_v7 = vadd.f32 %v590_v2, %v563_v58  ;;  %v598_v44 = vadd.f32 %v596_v4, %v572_v61 }
 0x115   : > { %v599_v10 = vsub.f32 %v597_v6, %v591_v5 }
 0x116   : > { %v600_v11 = vsub.f32 %v598_v44, %v592_v7 }
 0x117   : > { %v609_v12 = vmul.f32 %v604_v43, %v599_v10 }
 0x118   : > { %v610_v13 = vmul.f32 %v608_v9, %v600_v11 }
 0x119   : > { %v611_v15 = vadd.f32 %v609_v12, %v591_v5 }
 0x11a   : > { %v612_v16 = vadd.f32 %v610_v13, %v592_v7 }
 0x11c   : > { %v615_v18 = vcombine.low %v611_v15, %v612_v16 }
 0x11e   : > { %617 = vst [vmem:[%s975_s12] sm:$0xff] %v615_v18 }
 0x11f PF: > { %s26_s28 = sadd.s32 1, %s894_s28   ;;  %s1130_s1 = smov %s890_s27 }
 0x120   : > { %p23_p3 = scmp.ge.s32.totalorder %s26_s28, 4   ;;  %s1131_s27 = smov %s1133_s29 }
 0x122   :  { %25 = sbr.rel (!%p23_p3) target bundleno = 27 (0x1b), region = 92 }

</bundles_post_ra>
